<compile_context>
chip_gen: v7x
topology: tpu7x:2x2x1
jax: 0.10.0
libtpu: 0.0.40
codegen_flags: <defaults>
</compile_context>

<pallas_src>
from functools import partial

import jax
import jax.numpy as jnp
from jax.experimental import pallas as pl
from jax.experimental.pallas import tpu as pltpu

IGNORE_INDEX = -1  # must stay negative: a -1 target never matches a class index >= 0


def ce2d_kernel(x_ref, t_ref, out_ref, acc_ref, *, inv_hw):
    # x_ref:   (1, C, T)   logits tile (native dtype; cast to f32 here)
    # t_ref:   (1, 1, T)   int32 targets tile (padded lanes hold IGNORE_INDEX)
    # out_ref: (1, 1, 128) f32 per-batch mean loss (lane-splat; lane 0 is the loss)
    # acc_ref: (1, 1, 128) f32 running sum of per-pixel losses for this batch element
    hw_i = pl.program_id(1)

    @pl.when(hw_i == 0)
    def _():
        acc_ref[...] = jnp.zeros_like(acc_ref)

    x = x_ref[0].astype(jnp.float32)                 # (C, T)
    t = t_ref[0]                                     # (1, T) int32
    C, T = x.shape

    # Stable log-sum-exp over the channel (sublane) axis.
    m = jnp.max(x, axis=0, keepdims=True)            # (1, T)
    lse = jnp.log(jnp.sum(jnp.exp(x - m), axis=0, keepdims=True))  # (1, T)

    # x[target] via one-hot select over channels; targets of -1 (ignored / padded
    # lanes) never match, so picked == 0 there.
    cls = jax.lax.broadcasted_iota(jnp.int32, (C, T), 0)
    picked = jnp.sum(jnp.where(cls == t, x, 0.0), axis=0, keepdims=True)  # (1, T)

    # loss = -logp[target] = (m + lse) - x[target]; 0 for ignored/padded pixels.
    valid = t != IGNORE_INDEX                        # (1, T)
    tile_sum = jnp.sum(jnp.where(valid, (m + lse) - picked, 0.0))

    acc_ref[...] += tile_sum

    @pl.when(hw_i == pl.num_programs(1) - 1)
    def _():
        out_ref[...] = acc_ref[...] * jnp.float32(inv_hw)


def cross_entropy_loss_2d(logits_nchw, targets_nhw, tile_hw=32 * 1024):
    """logits_nchw: (N, C, H, W) float (f32/bf16/f16); targets_nhw: (N, H, W) int.

    Returns (N,) f32: per-batch mean of the per-pixel NLL (ignored pixels count 0
    in the numerator; denominator is the full H*W), matching the PyTorch module.
    """
    N, C, H, W = logits_nchw.shape
    HW = H * W

    x = logits_nchw.reshape(N, C, HW)                 # keep native dtype in HBM
    t = targets_nhw.reshape(N, 1, HW).astype(jnp.int32)

    # Lane tile: multiple of 128, capped at the (128-rounded) spatial size.
    hw_r128 = ((HW + 127) // 128) * 128
    tile = max(128, min((tile_hw // 128) * 128, hw_r128))
    HW_pad = ((HW + tile - 1) // tile) * tile
    if HW_pad != HW:
        # Neutralize padded lanes: arbitrary logits, ignore_index targets.
        x = jnp.pad(x, ((0, 0), (0, 0), (0, HW_pad - HW)))
        t = jnp.pad(t, ((0, 0), (0, 0), (0, HW_pad - HW)),
                    constant_values=IGNORE_INDEX)

    grid = (N, HW_pad // tile)
    kernel = partial(ce2d_kernel, inv_hw=1.0 / HW)    # true HW, not padded

    out = pl.pallas_call(
        kernel,
        out_shape=jax.ShapeDtypeStruct((N, 1, 128), jnp.float32),
        grid_spec=pltpu.PrefetchScalarGridSpec(
            num_scalar_prefetch=0,
            grid=grid,
            in_specs=[
                pl.BlockSpec((1, C, tile), lambda n, h: (n, 0, h)),
                pl.BlockSpec((1, 1, tile), lambda n, h: (n, 0, h)),
            ],
            out_specs=pl.BlockSpec((1, 1, 128), lambda n, h: (n, 0, 0)),
            scratch_shapes=[pltpu.VMEM((1, 1, 128), jnp.float32)],
        ),
        compiler_params=pltpu.CompilerParams(
            dimension_semantics=("parallel", "arbitrary")),
    )(x, t)
    return out[:, 0, 0]                               # (N,)


def reference_loss(logits_nchw, targets_nhw):
    """Pure-JAX reference mirroring the PyTorch module."""
    logp = jax.nn.log_softmax(logits_nchw.astype(jnp.float32), axis=1)
    t = targets_nhw.astype(jnp.int32)
    valid = t != IGNORE_INDEX
    safe_t = jnp.where(valid, t, 0)
    picked = jnp.take_along_axis(logp, safe_t[:, None, :, :], axis=1)[:, 0]
    loss = jnp.where(valid, -picked, 0.0)             # (N, H, W)
    return loss.mean(axis=2).mean(axis=1)             # (N,)


if __name__ == "__main__":
    N, C, H, W = 2, 4, 16, 16
    key = jax.random.PRNGKey(0)
    k_logits, k_targets = jax.random.split(key)
    logits = jax.random.normal(k_logits, (N, C, H, W), dtype=jnp.float32)
    # Targets in [-1, C): includes ignore_index == -1 pixels.
    targets = jax.random.randint(k_targets, (N, H, W), -1, C, dtype=jnp.int32)

    ref = reference_loss(logits, targets)

    # 1) f32 logits, single HW tile per batch element.
    out = jax.block_until_ready(cross_entropy_loss_2d(logits, targets))
    assert out.shape == (N,)
    assert jnp.allclose(out, ref, atol=1e-5, rtol=1e-5), (out, ref)

    # 2) Tiled-HW accumulation path (tile_hw=128 -> 2 tiles of 128 lanes per n).
    out_tiled = jax.block_until_ready(
        cross_entropy_loss_2d(logits, targets, tile_hw=128))
    assert jnp.allclose(out_tiled, ref, atol=1e-5, rtol=1e-5), (out_tiled, ref)

    # 3) bf16 logits stay bf16 in HBM; cast to f32 happens inside the kernel.
    logits_bf16 = logits.astype(jnp.bfloat16)
    out_bf16 = jax.block_until_ready(cross_entropy_loss_2d(logits_bf16, targets))
    ref_bf16 = reference_loss(logits_bf16, targets)
    assert jnp.allclose(out_bf16, ref_bf16, atol=2e-3, rtol=2e-3), (out_bf16, ref_bf16)

    print("KERNEL_OK")
</pallas_src>

<mosaic_0001>
module attributes {stable_mosaic.version = 11 : i64} {
  func.func @ce2d_kernel(%arg0: i32, %arg1: i32, %arg2: memref<1x4x256xf32, #tpu.memory_space<vmem>>, %arg3: memref<1x1x256xi32, #tpu.memory_space<vmem>>, %arg4: memref<1x1x128xf32, #tpu.memory_space<vmem>>, %arg5: memref<1x1x128xf32, #tpu.memory_space<vmem>>) attributes {dimension_semantics = [#tpu.dimension_semantics<parallel>, #tpu.dimension_semantics<arbitrary>], iteration_bounds = array<i64: 2, 1>, scalar_prefetch = 0 : i64, scratch_operands = 1 : i64, tpu.core_type = #tpu.core_type<tc>, window_params = [{transform_indices = @transform_0, window_bounds = array<i64: 1, 4, 256>}, {transform_indices = @transform_1, window_bounds = array<i64: 1, 1, 256>}, {transform_indices = @transform_2, window_bounds = array<i64: 1, 1, 128>}]} {
    %c0_i32 = arith.constant 0 : i32
    %0 = arith.cmpi eq, %arg1, %c0_i32 : i32
    %1 = arith.extui %0 : i1 to i32
    %c0_i32_0 = arith.constant 0 : i32
    %2 = arith.cmpi ne, %1, %c0_i32_0 : i32
    scf.if %2 {
      %cst_19 = arith.constant 0.000000e+00 : f32
      %39 = vector.broadcast %cst_19 : f32 to vector<1x1x128xf32>
      %c0_20 = arith.constant 0 : index
      %c0_21 = arith.constant 0 : index
      %c0_22 = arith.constant 0 : index
      %40 = vector.load %arg5[%c0_20, %c0_21, %c0_22] : memref<1x1x128xf32, #tpu.memory_space<vmem>>, vector<1x1x128xf32>
      tpu.vector_store %arg5[%c0_20, %c0_21, %c0_22], %39 {strides = array<i32>} : memref<1x1x128xf32, #tpu.memory_space<vmem>>, vector<1x1x128xf32>,
    } else {
    }
    %c0 = arith.constant 0 : index
    %c0_1 = arith.constant 0 : index
    %c0_2 = arith.constant 0 : index
    %3 = vector.load %arg2[%c0, %c0_1, %c0_2] : memref<1x4x256xf32, #tpu.memory_space<vmem>>, vector<1x4x256xf32>
    %4 = vector.shape_cast %3 : vector<1x4x256xf32> to vector<4x256xf32>
    %c0_3 = arith.constant 0 : index
    %c0_4 = arith.constant 0 : index
    %c0_5 = arith.constant 0 : index
    %5 = vector.load %arg3[%c0_3, %c0_4, %c0_5] : memref<1x1x256xi32, #tpu.memory_space<vmem>>, vector<1x1x256xi32>
    %6 = vector.shape_cast %5 : vector<1x1x256xi32> to vector<1x256xi32>
    %cst = arith.constant dense<0xFF800000> : vector<256xf32>
    %7 = vector.multi_reduction <maximumf>, %4, %cst [0] : vector<4x256xf32> to vector<256xf32>
    %8 = vector.shape_cast %7 : vector<256xf32> to vector<1x256xf32>
    %9 = vector.broadcast %8 : vector<1x256xf32> to vector<4x256xf32>
    %10 = arith.subf %4, %9 : vector<4x256xf32>
    %11 = math.exp %10 : vector<4x256xf32>
    %cst_6 = arith.constant dense<0.000000e+00> : vector<256xf32>
    %12 = vector.multi_reduction <add>, %11, %cst_6 [0] : vector<4x256xf32> to vector<256xf32>
    %13 = vector.shape_cast %12 : vector<256xf32> to vector<1x256xf32>
    %14 = math.log %13 : vector<1x256xf32>
    %15 = tpu.iota {dimensions = array<i32: 0>} : vector<4x256xi32>
    %16 = vector.broadcast %6 : vector<1x256xi32> to vector<4x256xi32>
    %17 = arith.cmpi eq, %15, %16 : vector<4x256xi32>
    %cst_7 = arith.constant 0.000000e+00 : f32
    %18 = vector.broadcast %cst_7 : f32 to vector<4x256xf32>
    %19 = arith.select %17, %4, %18 : vector<4x256xi1>, vector<4x256xf32>
    %cst_8 = arith.constant dense<0.000000e+00> : vector<256xf32>
    %20 = vector.multi_reduction <add>, %19, %cst_8 [0] : vector<4x256xf32> to vector<256xf32>
    %21 = vector.shape_cast %20 : vector<256xf32> to vector<1x256xf32>
    %c-1_i32 = arith.constant -1 : i32
    %22 = vector.broadcast %c-1_i32 : i32 to vector<1x256xi32>
    %23 = arith.cmpi ne, %6, %22 : vector<1x256xi32>
    %24 = arith.addf %8, %14 : vector<1x256xf32>
    %25 = arith.subf %24, %21 : vector<1x256xf32>
    %cst_9 = arith.constant 0.000000e+00 : f32
    %26 = vector.broadcast %cst_9 : f32 to vector<1x256xf32>
    %27 = arith.select %23, %25, %26 : vector<1x256xi1>, vector<1x256xf32>
    %28 = vector.shape_cast %27 : vector<1x256xf32> to vector<1x1x256xf32>
    %cst_10 = arith.constant dense<0.000000e+00> : vector<1xf32>
    %29 = vector.multi_reduction <add>, %28, %cst_10 [1, 2] : vector<1x1x256xf32> to vector<1xf32>
    %30 = vector.shape_cast %29 : vector<1xf32> to vector<1x1x1xf32>
    %31 = vector.extract %30[0, 0, 0] : f32 from vector<1x1x1xf32>
    %c0_11 = arith.constant 0 : index
    %c0_12 = arith.constant 0 : index
    %c0_13 = arith.constant 0 : index
    %32 = vector.load %arg5[%c0_11, %c0_12, %c0_13] : memref<1x1x128xf32, #tpu.memory_space<vmem>>, vector<1x1x128xf32>
    %33 = vector.broadcast %31 : f32 to vector<1x1x128xf32>
    %34 = arith.addf %32, %33 : vector<1x1x128xf32>
    %c0_14 = arith.constant 0 : index
    %c0_15 = arith.constant 0 : index
    %c0_16 = arith.constant 0 : index
    %35 = vector.load %arg5[%c0_14, %c0_15, %c0_16] : memref<1x1x128xf32, #tpu.memory_space<vmem>>, vector<1x1x128xf32>
    tpu.vector_store %arg5[%c0_14, %c0_15, %c0_16], %34 {strides = array<i32>} : memref<1x1x128xf32, #tpu.memory_space<vmem>>, vector<1x1x128xf32>,
    %c0_i32_17 = arith.constant 0 : i32
    %36 = arith.cmpi eq, %arg1, %c0_i32_17 : i32
    %37 = arith.extui %36 : i1 to i32
    %c0_i32_18 = arith.constant 0 : i32
    %38 = arith.cmpi ne, %37, %c0_i32_18 : i32
    scf.if %38 {
      %c0_19 = arith.constant 0 : index
      %c0_20 = arith.constant 0 : index
      %c0_21 = arith.constant 0 : index
      %39 = vector.load %arg5[%c0_19, %c0_20, %c0_21] : memref<1x1x128xf32, #tpu.memory_space<vmem>>, vector<1x1x128xf32>
      %cst_22 = arith.constant 3.906250e-03 : f32
      %40 = vector.broadcast %cst_22 : f32 to vector<1x1x128xf32>
      %41 = arith.mulf %39, %40 : vector<1x1x128xf32>
      %c0_23 = arith.constant 0 : index
      %c0_24 = arith.constant 0 : index
      %c0_25 = arith.constant 0 : index
      %42 = vector.load %arg4[%c0_23, %c0_24, %c0_25] : memref<1x1x128xf32, #tpu.memory_space<vmem>>, vector<1x1x128xf32>
      tpu.vector_store %arg4[%c0_23, %c0_24, %c0_25], %41 {strides = array<i32>} : memref<1x1x128xf32, #tpu.memory_space<vmem>>, vector<1x1x128xf32>,
    } else {
    }
    return
  }
  func.func @transform_0(%arg0: i32, %arg1: i32) -> (i32, i32, i32) {
    %c0_i32 = arith.constant 0 : i32
    %c0_i32_0 = arith.constant 0 : i32
    return %arg0, %c0_i32, %arg1 : i32, i32, i32
  }
  func.func @transform_1(%arg0: i32, %arg1: i32) -> (i32, i32, i32) {
    %c0_i32 = arith.constant 0 : i32
    %c0_i32_0 = arith.constant 0 : i32
    return %arg0, %c0_i32, %arg1 : i32, i32, i32
  }
  func.func @transform_2(%arg0: i32, %arg1: i32) -> (i32, i32, i32) {
    %c0_i32 = arith.constant 0 : i32
    %c0_i32_0 = arith.constant 0 : i32
    %c0_i32_1 = arith.constant 0 : i32
    return %arg0, %c0_i32, %c0_i32_0 : i32, i32, i32
  }
}

</mosaic_0001>

<bundles_post_ra>
// kernel: tpu_custom_call.1
= control target key start
LH: loop header
LB: loop body
LE: loop exit
PB: predicated region body
PF: predicated region fallthrough
CT: control target
= control target key end

     0   :  { %7 = vsyncpa [#allocation4], 0  ;;  %s967_s0 = inlined_call_operand.hbm [shape: f32[2,4,256], index: 0, kind: input, shape index: {}]   ;;  %s968_s1 = inlined_call_operand.hbm [shape: s32[2,1,256], index: 1, kind: input, shape index: {}]   ;;  %s969_s2 = inlined_call_operand.hbm [shape: f32[2,1,128], index: 2, kind: output, shape index: {}]  }
   0x1   :  { %9 = vsyncpa [#allocation4 + $0x1], 0 }
   0x2   :  { %10 = vsyncpa [#allocation7], 0 }
   0x3   :  { %12 = vsyncpa [#allocation7 + $0x1], 0 }
   0x4   :  { %13 = vsyncpa [#allocation5], 0 }
   0x5   :  { %15 = vsyncpa [#allocation5 + $0x1], 0  ;;  %s738_s9 = smov 0   ;;  %s740_s10 = smov 0  }
   0x6   :  { %s742_s11 = smov 0   ;;  %s744_s12 = smov 0  }
   0x7   :  { %s746_s13 = smov 0   ;;  %s748_s14 = smov 0  }
   0x8 LB: > { %s474_s15 = sadd.s32 4294967295, %s716_s14   ;;  %s475_s16 = sadd.s32 4294967294, %s716_s14   ;;  %s716_s14 = sphi %s748_s14, %s21_s14   ;;  %s712_s13 = sphi %s746_s13, %s989_s13   ;;  %s708_s12 = sphi %s744_s12, %s988_s12   ;;  %s704_s11 = sphi %s742_s11, %s987_s11   ;;  %s700_s10 = sphi %s740_s10, %s986_s10   ;;  %s696_s9 = sphi %s738_s9, %s985_s9  }
   0x9   : > { %s33_s17 = sadd.s32 1, %s712_s13  ;;  %s42_s18 = sadd.s32 1, %s704_s11 }
   0xa   : > { %p35_p0 = scmp.ge.s32.totalorder %s33_s17, 2  ;;  %p49_p1 = scmp.ne.s32.totalorder %s704_s11, %s700_s10 }
   0xb   : > { %p50_p2 = scmp.eq.s32.totalorder %s716_s14, 0  ;;  %p55_p3 = scmp.ne.s32.totalorder %s700_s10, %s696_s9 }
   0xc   : > { %s991_s17 = smov (%p35_p0, %s33_s17), 0  ;;  %p56_p5 = scmp.eq.s32.totalorder %s474_s15, 0 }
   0xd   : > { %p779_p4 = por %p50_p2, %p49_p1  ;;  %s37_s20 = ssub.s32 %s712_s13, %s991_s17 }
   0xe   : > { %p107_p6 = scmp.eq.s32.totalorder %s474_s15, 1  ;;  %p40_p7 = scmp.eq.s32.totalorder %s37_s20, 0 }
   0xf   : > { %p785_p8 = por %p56_p5, %p55_p3  ;;  %p113_p10 = scmp.eq.s32.totalorder %s475_s16, 1 }
  0x10   : > { %p789_p9 = por %p107_p6, %p49_p1  ;;  %p511_p13 = scmp.lt.s32.totalorder %s716_s14, 2 }
  0x11   : > { %s973_s21 = scalar_select %p785_p8, 1, 0 }
  0x12   : > { %s974_s22 = scalar_select %p789_p9, 1, 0 }
  0x13   : > { %s794_s23 = scalar_select %p40_p7, %s704_s11, %s42_s18  }
  0x14   : > { %p796_p11 = por %p113_p10, %p55_p3  ;;  %s803_s25 = sand.u32 1, %s704_s11  }
  0x15   : > { %s478_s26 = sshll.u32 %s803_s25, 3  ;;  %s490_s27 = sshll.u32 %s712_s13, 7 }
  0x16   : > { %s975_s24 = scalar_select %p796_p11, 1, 0 }
  0x17   : > { %s810_s30 = scalar_lea.hbm %s967_s0, %s490_s27  ;;  %s137_s3 = scalar_lea.vmem [#allocation3], %s478_s26 }
  0x18   : > { %s147_s4 = sshll.u32 %s137_s3, 4  ;;  %p816_p0 = pnand %p511_p13, %p779_p4  ;;  %s812_s4 = int_to_ptr.vmem [resolvable:$true] %s147_s4 }
  0x19   : > { %s134_s6 = scalar_lea.sflag [#allocation4], %s803_s25  ;;  %s570_s7 = scalar_lea.hbm %s810_s30, 128 }
  0x1a   : > { %p571_p3 = scmp.ne.s32.totalorder %s810_s30, %s570_s7  ;;  %p572_p5 = pneg %p816_p0 }
  0x1b   : > { %s575_s16 = scalar_lea.hbm %s967_s0, 256  ;;  %p576_p4 = scmp.lt.u32.totalorder %s810_s30, %s967_s0 }
  0x1c   : > { %p573_p6 = pnand %p572_p5, %p571_p3  ;;  %p577_p10 = scmp.lt.u32.totalorder %s575_s16, %s570_s7 }
  0x1d   : > { %p579_p12 = scmp.lt.u32.totalorder %s570_s7, %s810_s30 }
  0x1e   : > { %p574_p7 = pneg %p573_p6  ;;  %p578_p13 = por %p577_p10, %p576_p4 }
  0x20   : > { %p580_p1 = por %p579_p12, %p578_p13 }
  0x22   : > { %p581_p2 = pnand %p580_p1, %p574_p7 }
  0x24   : > { %584 = shalt.err (!%p581_p2)
}
  0x25   : > { %s585_s20 = scalar_lea.vmem %s812_s4, 128  ;;  %s718_s26 = smov [#allocation3]  }
  0x26   : > { %p586_p3 = scmp.ne.s32.totalorder %s812_s4, %s585_s20  ;;  %s590_s27 = sshll.u32 %s718_s26, 4  ;;  %s591_s27 = int_to_ptr.vmem [resolvable:$false] %s590_s27 }
  0x27   : > { %s592_s28 = scalar_lea.vmem %s591_s27, 256  ;;  %p593_p9 = scmp.lt.s32.totalorder %s812_s4, %s591_s27 }
  0x28   : > { %p588_p6 = pnand %p586_p3, %p572_p5  ;;  %p594_p4 = scmp.lt.s32.totalorder %s592_s28, %s585_s20 }
  0x2a   : > { %p589_p11 = pneg %p588_p6  ;;  %p595_p10 = por %p594_p4, %p593_p9 }
  0x2c   : > { %p596_p12 = pnand %p595_p10, %p589_p11 }
  0x2e   : > { %599 = shalt.err (!%p596_p12)
}
  0x2f   : > { %503 = dma.hbm_to_vmem [thread:$0]  (!%p816_p0), %s810_s30, 128, %s812_s4, %s134_s6  }
  0x30   : > { %p977_p1 = scmp.lt.s32.totalorder %s716_s14, 3  ;;  %p978_p2 = scmp.ge.s32.totalorder %s716_s14, 1 }
  0x31   : > { %s481_s3 = sshll.u32 %s803_s25, 1  ;;  %s491_s7 = sshll.u32 %s712_s13, 5 }
  0x32   : > { %p852_p7 = pnand %p978_p2, %p977_p1  ;;  %s861_s16 = scalar_lea.hbm %s968_s1, %s491_s7 }
  0x33   : > { %s158_s18 = scalar_lea.vmem [#allocation6], %s481_s3  ;;  %s155_s30 = scalar_lea.sflag [#allocation7], %s803_s25 }
  0x34   : > { %s979_s29 = scalar_select %p852_p7, 1, 0 }
  0x35   : > { %s168_s19 = sshll.u32 %s158_s18, 4  ;;  %s600_s4 = scalar_lea.hbm %s861_s16, 32  ;;  %s169_s19 = int_to_ptr.vmem [resolvable:$true] %s168_s19 }
  0x36   : > { %p601_p9 = scmp.ne.s32.totalorder %s861_s16, %s600_s4  ;;  %s605_s26 = scalar_lea.hbm %s968_s1, 64 }
  0x37   : > { %p606_p3 = scmp.lt.u32.totalorder %s861_s16, %s968_s1  ;;  %p607_p6 = scmp.lt.u32.totalorder %s605_s26, %s600_s4 }
  0x38   : > { %p603_p11 = pnand %p601_p9, %p572_p5  ;;  %p609_p10 = scmp.lt.u32.totalorder %s600_s4, %s861_s16 }
  0x39   : > { %p608_p4 = por %p607_p6, %p606_p3 }
  0x3a   : > { %p604_p13 = pneg %p603_p11 }
  0x3b   : > { %p610_p12 = por %p609_p10, %p608_p4 }
  0x3d   : > { %p611_p1 = pnand %p610_p12, %p604_p13 }
  0x3f   : > { %614 = shalt.err (!%p611_p1)
}
  0x40   : > { %s615_s25 = scalar_lea.vmem %s169_s19, 32  ;;  %s719_s3 = smov [#allocation6]  }
  0x41   : > { %p616_p2 = scmp.ne.s32.totalorder %s169_s19, %s615_s25  ;;  %s620_s7 = sshll.u32 %s719_s3, 4  ;;  %s621_s7 = int_to_ptr.vmem [resolvable:$false] %s620_s7 }
  0x42   : > { %s622_s8 = scalar_lea.vmem %s621_s7, 64  ;;  %p623_p8 = scmp.lt.s32.totalorder %s169_s19, %s621_s7 }
  0x43   : > { %p618_p9 = pnand %p616_p2, %p572_p5  ;;  %p624_p7 = scmp.lt.s32.totalorder %s622_s8, %s615_s25 }
  0x45   : > { %p619_p11 = pneg %p618_p9  ;;  %p625_p3 = por %p624_p7, %p623_p8 }
  0x47   : > { %p626_p6 = pnand %p625_p3, %p619_p11 }
  0x49   : > { %629 = shalt.err (!%p626_p6)
}
  0x4a   : > { %506 = dma.hbm_to_vmem [thread:$0]  (!%p816_p0), %s861_s16, 32, %s169_s19, %s155_s30  }
  0x4b   : > { %p980_p13 = scmp.ne.s32.totalorder %s979_s29, 0 }
  0x4c   : > { %s886_s15 = sand.u32 (!%p980_p13), 1, %s700_s10   ;;  %p981_p5 = scmp.ne.s32.totalorder (!%p980_p13), %s973_s21, 0 }
  0x4d   : > { %177 = sbr.rel (%p980_p13) target bundleno = 396 (0x18c), region = 28  ;;  %s485_s18 = sshll.u32 (!%p980_p13), %s886_s15, 3 }
  0x4e   : > { %s180_s4 = scalar_lea.sflag (!%p980_p13), [#allocation4], %s886_s15  ;;  %s183_s6 = scalar_lea.vmem (!%p980_p13), [#allocation3], %s485_s18 }
  0x54   : > { %683 = dma.done.wait (%p981_p5), %s180_s4, 128  }
  0x55   : > { %685 = vsyncadd (%p981_p5), %s180_s4, 4294967168  ;;  %s486_s5 = sshll.u32 %s886_s15, 1  ;;  %s189_s29 = scalar_lea.sflag [#allocation7], %s886_s15 }
  0x56   : > { %s192_s16 = scalar_lea.vmem [#allocation6], %s486_s5 }
  0x57   : > { %687 = dma.done.wait (%p981_p5), %s189_s29, 32  }
  0x58   : > { %689 = vsyncadd (%p981_p5), %s189_s29, 4294967264  ;;  %vm229_vm0 = vcmask 1043456   ;;  %v224_v0 = vld [vmem:[%s183_s6] sm:$0xff]  ;;  %v272_v15 = vlaneseq  ;;  %v225_v22 = vld [vmem:[%s192_s16] sm:$0x3]  ;;  %vm335_vm4 = vcmask 1040384  }
  0x59   : > { %v227_v1 = vcombine.high %v224_v0, %v224_v0  ;;  %v230_v2 = vsel %vm229_vm0, %v224_v0, -inf  ;;  %v720_v56 = vmov 1966171168   ;;  %vm300_vm3 = vcmp.ne.s32.totalorder %v225_v22, 4294967295  ;;  %s487_s19 = sshll.u32 %s708_s12, 4  ;;  %s216_s30 = scalar_lea.vmem [#allocation8], %s886_s15 }
  0x5a   : > { %v231_v3 = vrot.slane %v230_v2, 4  ;;  %v902_v18 = vshrl.u32 %v272_v15, 7  ;;  %v309_v57 = vunpack.c.l.s4 %v720_v56  ;;  %s371_s20 = sshll.u32 %s216_s30, 4  ;;  %s918_s28 = scalar_lea.hbm %s969_s2, %s487_s19  ;;  %s920_s20 = int_to_ptr.vmem [resolvable:$true] %s371_s20 }
  0x5b   : > { %v237_v4 = vsel %vm229_vm0, %v227_v1, -inf  ;;  %s359_s25 = scalar_lea.sflag [#allocation5], %s886_s15  ;;  %s630_s3 = scalar_lea.vmem %s920_s20, 16 }
  0x5c   : > { %v232_v5 = vmax.f32 %v230_v2, %v231_v3  ;;  %v238_v6 = vrot.slane %v237_v4, 4  ;;  %v276_v21 = vsub.s32 0, %v902_v18  ;;  %v280_v23 = vsub.s32 1, %v902_v18  ;;  %p631_p8 = scmp.ne.s32.totalorder %s920_s20, %s630_s3  ;;  %p982_p0 = scmp.ne.s32.totalorder %s974_s22, 0 }
  0x5d   : > { %s722_s12 = smov [#allocation8]  }
  0x5e   : > { %v233_v7 = vrot.slane %v232_v5, 2  ;;  %v239_v8 = vmax.f32 %v237_v4, %v238_v6  ;;  %v277_v24 = vrot.slane %v225_v22, %v276_v21  ;;  %v281_v25 = vrot.slane %v225_v22, %v280_v23  ;;  %p632_p7 = pnand %p631_p8, %p982_p0  ;;  %s634_s7 = sshll.u32 %s722_s12, 4  ;;  %s635_s7 = int_to_ptr.vmem [resolvable:$false] %s634_s7 }
  0x5f   : > { %s636_s8 = scalar_lea.vmem %s635_s7, 32  ;;  %p637_p10 = scmp.lt.s32.totalorder %s920_s20, %s635_s7 }
  0x60   : > { %v234_v9 = vmax.f32 %v232_v5, %v233_v7  ;;  %v240_v10 = vrot.slane %v239_v8, 2  ;;  %vm282_vm1 = vcmp.eq.s32.totalorder %v902_v18, %v277_v24  ;;  %vm283_vm2 = vcmp.eq.s32.totalorder %v902_v18, %v281_v25  ;;  %p633_p4 = pneg %p632_p7  ;;  %p638_p12 = scmp.lt.s32.totalorder %s636_s8, %s630_s3 }
  0x61   : > { %v284_v26 = vsel %vm282_vm1, %v224_v0, 0.0  ;;  %v285_v30 = vsel %vm283_vm2, %v227_v1, 0.0  ;;  %v310_v1 = vunpack.c.0.s8 %v309_v57 }
  0x62   : > { %v235_v11 = vrot.slane %v234_v9, 1  ;;  %v241_v12 = vmax.f32 %v239_v8, %v240_v10  ;;  %v286_v32 = vsel %vm229_vm0, %v284_v26, 0.0  ;;  %v293_v36 = vsel %vm229_vm0, %v285_v30, 0.0  ;;  %p639_p1 = por %p638_p12, %p637_p10 }
  0x63   : > { %v287_v37 = vrot.slane %v286_v32, 4  ;;  %v294_v40 = vrot.slane %v293_v36, 4  ;;  %v313_v5 = vsub.s32 %v310_v1, %v902_v18 }
  0x64   : > { %v236_v13 = vmax.f32 %v234_v9, %v235_v11  ;;  %v242_v14 = vrot.slane %v241_v12, 1  ;;  %p640_p2 = pnand %p639_p1, %p633_p4 }
  0x65   : > { %v288_v43 = vadd.f32 %v287_v37, %v286_v32  ;;  %v295_v46 = vadd.f32 %v294_v40, %v293_v36 }
  0x66   : > { %v243_v16 = vmax.f32 %v241_v12, %v242_v14 }
  0x67   : > { %v289_v49 = vrot.slane %v288_v43, 2  ;;  %v296_v51 = vrot.slane %v295_v46, 2 }
  0x68   : > { %v246_v17 = vcombine.low %v236_v13, %v243_v16 }
  0x69   : > { %v290_v52 = vadd.f32 %v289_v49, %v288_v43  ;;  %v297_v53 = vadd.f32 %v296_v51, %v295_v46 }
  0x6a   : > { %v248_v19 = vsub.f32 %v224_v0, %v246_v17 }
  0x6b   : > { %v291_v54 = vrot.slane %v290_v52, 1  ;;  %v298_v55 = vrot.slane %v297_v53, 1 }
  0x6c   : > { %v249_v20 = vmul.f32 1.442695, %v248_v19 }
  0x6d   : > { %v292_v60 = vadd.f32 %v291_v54, %v290_v52  ;;  %v299_v63 = vadd.f32 %v298_v55, %v297_v53 }
  0x6e   : > { %564 = vpow2.f32 %v249_v20 }
  0x78   : > { %v565_v27 = vpop.eup %564 }
  0x79   : > { %v252_v28 = vcombine.high %v565_v27, %v565_v27  ;;  %v254_v29 = vsel %vm229_vm0, %v565_v27, 0.0 }
  0x7a   : > { %v255_v31 = vrot.slane %v254_v29, 4 }
  0x7b   : > { %v261_v33 = vsel %vm229_vm0, %v252_v28, 0.0 }
  0x7c   : > { %v256_v34 = vadd.f32 %v255_v31, %v254_v29  ;;  %v262_v35 = vrot.slane %v261_v33, 4 }
  0x7e   : > { %v257_v38 = vrot.slane %v256_v34, 2  ;;  %v263_v39 = vadd.f32 %v262_v35, %v261_v33 }
  0x80   : > { %v258_v41 = vadd.f32 %v257_v38, %v256_v34  ;;  %v264_v42 = vrot.slane %v263_v39, 2 }
  0x82   : > { %v259_v44 = vrot.slane %v258_v41, 1  ;;  %v265_v45 = vadd.f32 %v264_v42, %v263_v39 }
  0x84   : > { %v260_v47 = vadd.f32 %v259_v44, %v258_v41  ;;  %v266_v48 = vrot.slane %v265_v45, 1 }
  0x86   : > { %v267_v50 = vadd.f32 %v266_v48, %v265_v45  ;;  %566 = vlog2.f32 %v260_v47 }
  0x88   : > { %568 = vlog2.f32 %v267_v50 }
  0x90   : > { %v567_v58 = vpop.eup %566 }
  0x91   : > { %v269_v59 = vmul.f32 0.6931472, %v567_v58 }
  0x92   : > { %v569_v61 = vpop.eup %568 }
  0x93   : > { %v271_v62 = vmul.f32 0.6931472, %v569_v61  ;;  %v301_v0 = vadd.f32 %v269_v59, %v236_v13  ;;  %v721_v13 = vmov 0.0  }
  0x94   : > { %223 = vst [vmem:[#allocation2] sm:$0x1] %v721_v13 }
  0x95   : > { %v302_v2 = vadd.f32 %v271_v62, %v243_v16  ;;  %v303_v3 = vsub.f32 %v301_v0, %v292_v60 }
  0x97   : > { %v304_v4 = vsub.f32 %v302_v2, %v299_v63 }
  0x99   : > { %v307_v6 = vcombine.low %v303_v3, %v304_v4 }
  0x9b   : > { %v314_v7 = vrot.slane %v307_v6, %v313_v5  ;;  %v348_v25 = vld [vmem:[#allocation2] sm:$0x1] }
  0x9d   : > { %v321_v8 = vrot.slane %v314_v7, %v313_v5 }
  0x9f   : > { %v323_v9 = vsel %vm300_vm3, %v321_v8, 0.0 }
  0xa0   : > { %v328_v10 = vrot.slane %v323_v9, %v276_v21  ;;  %v332_v11 = vrot.slane %v323_v9, %v280_v23 }
  0xa2   : > { %v336_v12 = vsel %vm335_vm4, %v328_v10, 0.0  ;;  %v337_v14 = vsel %vm335_vm4, %v332_v11, 0.0 }
  0xa3   : > { %v338_v15 = vadd.f32 %v337_v14, %v336_v12 }
  0xa5   : > { %339 = vadd.xlane.f32.xlu0 %v338_v15 }
 0x132   : > { %v340_v16 = vpop.xlane.xlu0 %339 }
 0x133   : > { %v341_v17 = vrot.slane %v340_v16, 4 }
 0x135   : > { %v342_v19 = vadd.f32 %v341_v17, %v340_v16 }
 0x137   : > { %v343_v18 = vrot.slane %v342_v19, 2 }
 0x139   : > { %v344_v20 = vadd.f32 %v343_v18, %v342_v19 }
 0x13b   : > { %v345_v24 = vrot.slane %v344_v20, 1 }
 0x13d   : > { %v346_v22 = vadd.f32 %v345_v24, %v344_v20 }
 0x13f   : > { %492 = vpush %v346_v22 }
 0x170   : > { %s493_s21 = spop %492 }
 0x171   : > { %v349_v21 = vstv %s493_s21 }
 0x172   : > { %v350_v23 = vadd.f32 %v349_v21, %v348_v25 }
 0x174   : > { %351 = vst [vmem:[#allocation2] sm:$0x1] %v350_v23 }
 0x17b   : > { %v355_v26 = vld [vmem:[#allocation2] sm:$0x1] }
 0x17c   : > { %v356_v27 = vmul.f32 0.00390625, %v355_v26 }
 0x17e   : > { %357 = vst [vmem:[%s216_s30] sm:$0x1] %v356_v27 }
 0x17f   : > { %643 = shalt.err (!%p640_p2)
}
 0x180   : > { %s644_s15 = scalar_lea.hbm %s918_s28, 16  ;;  %s648_s6 = scalar_lea.hbm %s969_s2, 32 }
 0x181   : > { %p645_p9 = scmp.ne.s32.totalorder %s918_s28, %s644_s15  ;;  %p649_p6 = scmp.lt.u32.totalorder %s918_s28, %s969_s2 }
 0x182   : > { %p650_p13 = scmp.lt.u32.totalorder %s648_s6, %s644_s15  ;;  %p652_p8 = scmp.lt.u32.totalorder %s644_s15, %s918_s28 }
 0x183   : > { %p646_p11 = pnand %p645_p9, %p982_p0 }
 0x184   : > { %p651_p5 = por %p650_p13, %p649_p6 }
 0x185   : > { %p647_p3 = pneg %p646_p11 }
 0x186   : > { %p653_p7 = por %p652_p8, %p651_p5 }
 0x188   : > { %p654_p4 = pnand %p653_p7, %p647_p3 }
 0x18a   : > { %657 = shalt.err (!%p654_p4)
}
 0x18b   : > { %498 = dma.vmem_to_hbm [thread:$0]  (%p982_p0), %s920_s20, 16, %s918_s28, %s359_s25  }
 0x18c PF: > { %s383_s16 = sand.u32 1, %s696_s9   ;;  %p983_p10 = scmp.ne.s32.totalorder %s975_s24, 0 }
 0x18d   : > { %p984_p12 = scmp.ge.s32.totalorder %s716_s14, 2  ;;  %s384_s21 = scalar_lea.sflag [#allocation5], %s383_s16 }
 0x18f   : > { %p508_p1 = pnand %p984_p12, %p983_p10 }
 0x191   : > { %691 = dma.done.wait (!%p508_p1), %s384_s21, 16  }
 0x192   : > { %693 = vsyncadd (!%p508_p1), %s384_s21, 4294967280  ;;  %s21_s14 = sadd.s32 1, %s716_s14   ;;  %s985_s9 = smov %s700_s10 }
 0x193   : > { %p18_p2 = scmp.ge.s32.totalorder %s21_s14, 4   ;;  %s986_s10 = smov %s704_s11 }
 0x194   : > { %s987_s11 = smov %s794_s23  ;;  %s988_s12 = smov %s712_s13 }
 0x195   : > { %s989_s13 = smov %s991_s17  ;;  %20 = sbr.rel (!%p18_p2) target bundleno = 8 (0x8), region = 94 }
 0x19c   :  { %388 = vsyncpa [#allocation4], 1 }
 0x19d   :  { %390 = vsyncpa [#allocation4 + $0x1], 1 }
 0x19e   :  { %391 = vsyncpa [#allocation7], 1 }
 0x19f   :  { %393 = vsyncpa [#allocation7 + $0x1], 1 }
 0x1a0   :  { %394 = vsyncpa [#allocation5], 1 }
 0x1a1   :  { %396 = vsyncpa [#allocation5 + $0x1], 1 }

</bundles_post_ra>
